<compile_context>
chip_gen: v7x
topology: tpu7x:2x2x1
jax: 0.10.0
libtpu: 0.0.40
codegen_flags: <defaults>
</compile_context>

<pallas_src>
import functools

import jax
import jax.numpy as jnp
from jax.experimental import pallas as pl
from jax.experimental.pallas import tpu as pltpu

_LANE = 128
_SUBLANE = 8


def _round_up(n, m):
    return ((n + m - 1) // m) * m


# ----------------------------------------------------------------------------
# Kernel
# ----------------------------------------------------------------------------
def mlp_kernel(x_ref, w_ref, b_ref, alpha_ref, out_ref, *, in_features):
    """One batch tile of the 5-layer MLP.

    x_ref:     (tb, in_features) f32 batch tile (cast to bf16 in-kernel).
    w_ref:     (5, 128, 128) bf16 packed, zero-padded weights (VMEM-resident).
    b_ref:     (5, 128) f32 packed, zero-padded biases.
    alpha_ref: (1, 1) f32 shared PReLU parameter in SMEM.
    Accumulation, bias add and PReLU run in f32 on the VPU; matmuls feed the
    MXU with bf16 operands and f32 accumulation.
    """
    alpha = alpha_ref[0, 0]
    k_pad = w_ref.shape[1]  # 128 (static)

    def layer(h_bf16, l, k, prelu):
        w = w_ref[l, :k, :]                                   # (k, 128) bf16
        acc = jnp.dot(h_bf16, w, preferred_element_type=jnp.float32)
        acc = acc + b_ref[l:l + 1, :]                         # (1, 128) bcast
        if prelu:
            acc = jnp.where(acc >= 0, acc, alpha * acc)
        return acc

    h = x_ref[...].astype(jnp.bfloat16)                       # in-kernel cast
    k1 = _round_up(in_features, _SUBLANE)
    if k1 != in_features:                                     # not hit at F=32
        h = jnp.concatenate(
            [h, jnp.zeros((h.shape[0], k1 - in_features), jnp.bfloat16)],
            axis=1)

    h = layer(h, 0, k1, True).astype(jnp.bfloat16)            # fc1 + PReLU
    h = layer(h, 1, k_pad, True).astype(jnp.bfloat16)         # fc2 + PReLU
    h = layer(h, 2, k_pad, True).astype(jnp.bfloat16)         # fc3 + PReLU
    h = layer(h, 3, k_pad, True).astype(jnp.bfloat16)         # fc4 + PReLU
    out = layer(h, 4, k_pad, False)                           # fc5 (no act)
    out_ref[...] = out.astype(out_ref.dtype)


# ----------------------------------------------------------------------------
# Parameter prep (done once): pad to 128-lane multiples, cast weights to bf16,
# pack weights and biases into single arrays, reshape alpha for SMEM.
# ----------------------------------------------------------------------------
def prepare_params(params):
    (w1, b1, w2, b2, w3, b3, w4, b4, w5, b5, alpha) = params
    ws = [w1, w2, w3, w4, w5]
    bs = [b1, b2, b3, b4, b5]

    k_pad = _round_up(max(w.shape[0] for w in ws), _LANE)     # 128
    n_pad = _round_up(max(w.shape[1] for w in ws), _LANE)     # 128

    w_packed = jnp.stack(
        [jnp.pad(w, ((0, k_pad - w.shape[0]), (0, n_pad - w.shape[1])))
         for w in ws], axis=0).astype(jnp.bfloat16)           # (5, 128, 128)

    b_packed = jnp.stack(
        [jnp.pad(b, (0, n_pad - b.shape[0])) for b in bs],
        axis=0).astype(jnp.float32)                           # (5, 128)

    alpha_smem = jnp.asarray(alpha, jnp.float32).reshape(1, 1)
    return w_packed, b_packed, alpha_smem


# ----------------------------------------------------------------------------
# Wrapper
# ----------------------------------------------------------------------------
@functools.partial(jax.jit,
                   static_argnames=("num_classes", "batch_tile", "out_dtype"))
def net_forward(x, w_packed, b_packed, alpha_smem, num_classes,
                batch_tile=1024, out_dtype=jnp.float32):
    B, F = x.shape
    n_pad = w_packed.shape[2]

    # Balanced batch tiling:
    #  * tiles are a multiple of 16 rows (bf16 sublane packing) when B >= 16,
    #  * at least 2 grid steps when B is big enough, so the "parallel" axis
    #    shards across both TensorCores on v7x (cheap on 1-TC v5e/v6e),
    #  * tail padding bounded per tile instead of up to a whole batch_tile.
    sub = 16 if B >= 16 else _SUBLANE
    min_tiles = 2 if B >= 2 * sub else 1
    n_tiles = max(pl.cdiv(B, batch_tile), min_tiles)
    tb = _round_up(pl.cdiv(B, n_tiles), sub)
    n_tiles = pl.cdiv(B, tb)
    Bp = n_tiles * tb

    # Only the small batch tail (if any) is padded; x keeps its original f32
    # dtype and narrow lane width -- no wrapper-side lane pad / bf16 cast.
    xp = x if Bp == B else jnp.pad(x, ((0, Bp - B), (0, 0)))

    kernel = functools.partial(mlp_kernel, in_features=F)

    # VMEM footprint is tiny (<~3 MiB even at tb=1024 incl. double buffers);
    # default scoped VMEM is plenty on v5e/v6e/v7x.
    out = pl.pallas_call(
        kernel,
        out_shape=jax.ShapeDtypeStruct((Bp, n_pad), out_dtype),
        grid=(n_tiles,),
        in_specs=[
            pl.BlockSpec((tb, F), lambda i: (i, 0)),            # x batch tile
            pl.BlockSpec(w_packed.shape, lambda i: (0, 0, 0)),  # weights: 1 DMA
            pl.BlockSpec(b_packed.shape, lambda i: (0, 0)),     # packed biases
            pl.BlockSpec((1, 1), lambda i: (0, 0),
                         memory_space=pltpu.SMEM),              # PReLU alpha
        ],
        out_specs=pl.BlockSpec((tb, n_pad), lambda i: (i, 0)),
        compiler_params=pltpu.CompilerParams(
            dimension_semantics=("parallel",)),                 # 2 TCs on v7x
    )(xp, w_packed, b_packed, alpha_smem)

    return out[:B, :num_classes].astype(jnp.float32)


# ----------------------------------------------------------------------------
# Reference + init
# ----------------------------------------------------------------------------
def init_params(key, input_size, hs1, hs2, hs3, hs4, num_classes):
    """Deterministic synthetic parameter init (PyTorch-like uniform fan-in)."""
    sizes = [(input_size, hs1), (hs1, hs2), (hs2, hs3), (hs3, hs4),
             (hs4, num_classes)]
    params = []
    for (fan_in, fan_out) in sizes:
        key, kw, kb = jax.random.split(key, 3)
        bound = 1.0 / jnp.sqrt(fan_in)
        w = jax.random.uniform(kw, (fan_in, fan_out), jnp.float32,
                               minval=-bound, maxval=bound)
        b = jax.random.uniform(kb, (fan_out,), jnp.float32,
                               minval=-bound, maxval=bound)
        params += [w, b]
    alpha = jnp.array(0.25, dtype=jnp.float32)   # nn.PReLU() default init
    params.append(alpha)
    return tuple(params)


def reference_forward(x, params, bf16_matmul=False):
    (w1, b1, w2, b2, w3, b3, w4, b4, w5, b5, alpha) = params

    def dot(a, w):
        if bf16_matmul:
            return jnp.dot(a.astype(jnp.bfloat16), w.astype(jnp.bfloat16),
                           preferred_element_type=jnp.float32)
        return jnp.dot(a, w, preferred_element_type=jnp.float32)

    def prelu(h):
        return jnp.where(h >= 0, h, alpha * h)

    h = prelu(dot(x, w1) + b1)
    h = prelu(dot(h, w2) + b2)
    h = prelu(dot(h, w3) + b3)
    h = prelu(dot(h, w4) + b4)
    return dot(h, w5) + b5


# ----------------------------------------------------------------------------
# Main
# ----------------------------------------------------------------------------
if __name__ == "__main__":
    # Small shapes consistent with the module's forward pass.
    B, input_size = 8, 32
    hs1, hs2, hs3, hs4 = 64, 48, 64, 32
    num_classes = 16

    key = jax.random.PRNGKey(0)
    key, kx = jax.random.split(key)
    x = jax.random.normal(kx, (B, input_size), dtype=jnp.float32)

    params = init_params(key, input_size, hs1, hs2, hs3, hs4, num_classes)
    w_packed, b_packed, alpha_smem = prepare_params(params)

    out = net_forward(x, w_packed, b_packed, alpha_smem,
                      num_classes=num_classes)
    out = jax.block_until_ready(out)
    assert out.shape == (B, num_classes)

    # Strict check against a bf16-matmul-matched reference...
    ref_bf16 = reference_forward(x, params, bf16_matmul=True)
    assert jnp.allclose(out, ref_bf16, atol=1e-3, rtol=1e-3), \
        "mismatch vs bf16-matched reference"
    # ...and a looser check against the pure-f32 module semantics.
    ref_f32 = reference_forward(x, params, bf16_matmul=False)
    assert jnp.allclose(out, ref_f32, atol=5e-2, rtol=5e-2), \
        "mismatch vs f32 reference"

    print("KERNEL_OK")
</pallas_src>

<mosaic_0001>
module attributes {stable_mosaic.version = 11 : i64} {
  func.func @mlp_kernel(%arg0: i32, %arg1: memref<8x32xf32, #tpu.memory_space<vmem>>, %arg2: memref<5x128x128xbf16, #tpu.memory_space<vmem>>, %arg3: memref<5x128xf32, #tpu.memory_space<vmem>>, %arg4: memref<1x1xf32, #tpu.memory_space<smem>>, %arg5: memref<8x128xf32, #tpu.memory_space<vmem>>) attributes {dimension_semantics = [#tpu.dimension_semantics<parallel>], iteration_bounds = array<i64: 1>, scalar_prefetch = 0 : i64, scratch_operands = 0 : i64, tpu.core_type = #tpu.core_type<tc>, window_params = [{transform_indices = @transform_0, window_bounds = array<i64: 8, 32>}, {pipeline_mode = #tpu.pipeline_mode<synchronous>, transform_indices = @transform_1, window_bounds = array<i64: 5, 128, 128>}, {pipeline_mode = #tpu.pipeline_mode<synchronous>, transform_indices = @transform_2, window_bounds = array<i64: 5, 128>}, {transform_indices = @transform_3, window_bounds = array<i64: 1, 1>}, {transform_indices = @transform_4, window_bounds = array<i64: 8, 128>}]} {
    %c0 = arith.constant 0 : index
    %c0_0 = arith.constant 0 : index
    %0 = memref.load %arg4[%c0, %c0_0] : memref<1x1xf32, #tpu.memory_space<smem>>
    %c0_1 = arith.constant 0 : index
    %c0_2 = arith.constant 0 : index
    %1 = vector.load %arg1[%c0_1, %c0_2] : memref<8x32xf32, #tpu.memory_space<vmem>>, vector<8x32xf32>
    %2 = arith.truncf %1 : vector<8x32xf32> to vector<8x32xbf16>
    %c0_3 = arith.constant 0 : index
    %c0_4 = arith.constant 0 : index
    %c0_5 = arith.constant 0 : index
    %3 = vector.load %arg2[%c0_3, %c0_4, %c0_5] : memref<5x128x128xbf16, #tpu.memory_space<vmem>>, vector<1x32x128xbf16>
    %4 = vector.shape_cast %3 : vector<1x32x128xbf16> to vector<32x128xbf16>
    %cst = arith.constant dense<0.000000e+00> : vector<8x128xf32>
    %5 = tpu.matmul %2, %4, %cst {dimension_numbers = #tpu.dot_dimension_numbers<[1], [0], [0], [1], [0, 0, 1, 1], [], []>} : vector<8x32xbf16>, vector<32x128xbf16>, vector<8x128xf32> -> vector<8x128xf32>
    %c0_6 = arith.constant 0 : index
    %c0_7 = arith.constant 0 : index
    %6 = vector.load %arg3[%c0_6, %c0_7] : memref<5x128xf32, #tpu.memory_space<vmem>>, vector<1x128xf32>
    %7 = vector.broadcast %6 : vector<1x128xf32> to vector<8x128xf32>
    %8 = arith.addf %5, %7 : vector<8x128xf32>
    %cst_8 = arith.constant 0.000000e+00 : f32
    %9 = vector.broadcast %cst_8 : f32 to vector<8x128xf32>
    %10 = arith.cmpf oge, %8, %9 : vector<8x128xf32>
    %11 = vector.broadcast %0 : f32 to vector<8x128xf32>
    %12 = arith.mulf %11, %8 : vector<8x128xf32>
    %13 = arith.select %10, %8, %12 : vector<8x128xi1>, vector<8x128xf32>
    %14 = arith.truncf %13 : vector<8x128xf32> to vector<8x128xbf16>
    %c1 = arith.constant 1 : index
    %c0_9 = arith.constant 0 : index
    %c0_10 = arith.constant 0 : index
    %15 = vector.load %arg2[%c1, %c0_9, %c0_10] : memref<5x128x128xbf16, #tpu.memory_space<vmem>>, vector<1x128x128xbf16>
    %16 = vector.shape_cast %15 : vector<1x128x128xbf16> to vector<128x128xbf16>
    %cst_11 = arith.constant dense<0.000000e+00> : vector<8x128xf32>
    %17 = tpu.matmul %14, %16, %cst_11 {dimension_numbers = #tpu.dot_dimension_numbers<[1], [0], [0], [1], [0, 0, 1, 1], [], []>} : vector<8x128xbf16>, vector<128x128xbf16>, vector<8x128xf32> -> vector<8x128xf32>
    %c1_12 = arith.constant 1 : index
    %c0_13 = arith.constant 0 : index
    %18 = vector.load %arg3[%c1_12, %c0_13] : memref<5x128xf32, #tpu.memory_space<vmem>>, vector<1x128xf32>
    %19 = vector.broadcast %18 : vector<1x128xf32> to vector<8x128xf32>
    %20 = arith.addf %17, %19 : vector<8x128xf32>
    %cst_14 = arith.constant 0.000000e+00 : f32
    %21 = vector.broadcast %cst_14 : f32 to vector<8x128xf32>
    %22 = arith.cmpf oge, %20, %21 : vector<8x128xf32>
    %23 = vector.broadcast %0 : f32 to vector<8x128xf32>
    %24 = arith.mulf %23, %20 : vector<8x128xf32>
    %25 = arith.select %22, %20, %24 : vector<8x128xi1>, vector<8x128xf32>
    %26 = arith.truncf %25 : vector<8x128xf32> to vector<8x128xbf16>
    %c2 = arith.constant 2 : index
    %c0_15 = arith.constant 0 : index
    %c0_16 = arith.constant 0 : index
    %27 = vector.load %arg2[%c2, %c0_15, %c0_16] : memref<5x128x128xbf16, #tpu.memory_space<vmem>>, vector<1x128x128xbf16>
    %28 = vector.shape_cast %27 : vector<1x128x128xbf16> to vector<128x128xbf16>
    %cst_17 = arith.constant dense<0.000000e+00> : vector<8x128xf32>
    %29 = tpu.matmul %26, %28, %cst_17 {dimension_numbers = #tpu.dot_dimension_numbers<[1], [0], [0], [1], [0, 0, 1, 1], [], []>} : vector<8x128xbf16>, vector<128x128xbf16>, vector<8x128xf32> -> vector<8x128xf32>
    %c2_18 = arith.constant 2 : index
    %c0_19 = arith.constant 0 : index
    %30 = vector.load %arg3[%c2_18, %c0_19] : memref<5x128xf32, #tpu.memory_space<vmem>>, vector<1x128xf32>
    %31 = vector.broadcast %30 : vector<1x128xf32> to vector<8x128xf32>
    %32 = arith.addf %29, %31 : vector<8x128xf32>
    %cst_20 = arith.constant 0.000000e+00 : f32
    %33 = vector.broadcast %cst_20 : f32 to vector<8x128xf32>
    %34 = arith.cmpf oge, %32, %33 : vector<8x128xf32>
    %35 = vector.broadcast %0 : f32 to vector<8x128xf32>
    %36 = arith.mulf %35, %32 : vector<8x128xf32>
    %37 = arith.select %34, %32, %36 : vector<8x128xi1>, vector<8x128xf32>
    %38 = arith.truncf %37 : vector<8x128xf32> to vector<8x128xbf16>
    %c3 = arith.constant 3 : index
    %c0_21 = arith.constant 0 : index
    %c0_22 = arith.constant 0 : index
    %39 = vector.load %arg2[%c3, %c0_21, %c0_22] : memref<5x128x128xbf16, #tpu.memory_space<vmem>>, vector<1x128x128xbf16>
    %40 = vector.shape_cast %39 : vector<1x128x128xbf16> to vector<128x128xbf16>
    %cst_23 = arith.constant dense<0.000000e+00> : vector<8x128xf32>
    %41 = tpu.matmul %38, %40, %cst_23 {dimension_numbers = #tpu.dot_dimension_numbers<[1], [0], [0], [1], [0, 0, 1, 1], [], []>} : vector<8x128xbf16>, vector<128x128xbf16>, vector<8x128xf32> -> vector<8x128xf32>
    %c3_24 = arith.constant 3 : index
    %c0_25 = arith.constant 0 : index
    %42 = vector.load %arg3[%c3_24, %c0_25] : memref<5x128xf32, #tpu.memory_space<vmem>>, vector<1x128xf32>
    %43 = vector.broadcast %42 : vector<1x128xf32> to vector<8x128xf32>
    %44 = arith.addf %41, %43 : vector<8x128xf32>
    %cst_26 = arith.constant 0.000000e+00 : f32
    %45 = vector.broadcast %cst_26 : f32 to vector<8x128xf32>
    %46 = arith.cmpf oge, %44, %45 : vector<8x128xf32>
    %47 = vector.broadcast %0 : f32 to vector<8x128xf32>
    %48 = arith.mulf %47, %44 : vector<8x128xf32>
    %49 = arith.select %46, %44, %48 : vector<8x128xi1>, vector<8x128xf32>
    %50 = arith.truncf %49 : vector<8x128xf32> to vector<8x128xbf16>
    %c4 = arith.constant 4 : index
    %c0_27 = arith.constant 0 : index
    %c0_28 = arith.constant 0 : index
    %51 = vector.load %arg2[%c4, %c0_27, %c0_28] : memref<5x128x128xbf16, #tpu.memory_space<vmem>>, vector<1x128x128xbf16>
    %52 = vector.shape_cast %51 : vector<1x128x128xbf16> to vector<128x128xbf16>
    %cst_29 = arith.constant dense<0.000000e+00> : vector<8x128xf32>
    %53 = tpu.matmul %50, %52, %cst_29 {dimension_numbers = #tpu.dot_dimension_numbers<[1], [0], [0], [1], [0, 0, 1, 1], [], []>} : vector<8x128xbf16>, vector<128x128xbf16>, vector<8x128xf32> -> vector<8x128xf32>
    %c4_30 = arith.constant 4 : index
    %c0_31 = arith.constant 0 : index
    %54 = vector.load %arg3[%c4_30, %c0_31] : memref<5x128xf32, #tpu.memory_space<vmem>>, vector<1x128xf32>
    %55 = vector.broadcast %54 : vector<1x128xf32> to vector<8x128xf32>
    %56 = arith.addf %53, %55 : vector<8x128xf32>
    %c0_32 = arith.constant 0 : index
    %c0_33 = arith.constant 0 : index
    %57 = vector.load %arg5[%c0_32, %c0_33] : memref<8x128xf32, #tpu.memory_space<vmem>>, vector<8x128xf32>
    tpu.vector_store %arg5[%c0_32, %c0_33], %56 {strides = array<i32>} : memref<8x128xf32, #tpu.memory_space<vmem>>, vector<8x128xf32>,
    return
  }
  func.func @transform_0(%arg0: i32) -> (i32, i32) {
    %c0_i32 = arith.constant 0 : i32
    %c0_i32_0 = arith.constant 0 : i32
    return %arg0, %c0_i32 : i32, i32
  }
  func.func @transform_1(%arg0: i32) -> (i32, i32, i32) {
    %c0_i32 = arith.constant 0 : i32
    %c0_i32_0 = arith.constant 0 : i32
    %c0_i32_1 = arith.constant 0 : i32
    %c0_i32_2 = arith.constant 0 : i32
    return %c0_i32, %c0_i32_0, %c0_i32_1 : i32, i32, i32
  }
  func.func @transform_2(%arg0: i32) -> (i32, i32) {
    %c0_i32 = arith.constant 0 : i32
    %c0_i32_0 = arith.constant 0 : i32
    %c0_i32_1 = arith.constant 0 : i32
    return %c0_i32, %c0_i32_0 : i32, i32
  }
  func.func @transform_3(%arg0: i32) -> (i32, i32) {
    %c0_i32 = arith.constant 0 : i32
    %c0_i32_0 = arith.constant 0 : i32
    %c0_i32_1 = arith.constant 0 : i32
    return %c0_i32, %c0_i32_0 : i32, i32
  }
  func.func @transform_4(%arg0: i32) -> (i32, i32) {
    %c0_i32 = arith.constant 0 : i32
    %c0_i32_0 = arith.constant 0 : i32
    return %arg0, %c0_i32 : i32, i32
  }
}

</mosaic_0001>

<bundles_post_ra>
// kernel: net_forward.1
= control target key start
LH: loop header
LB: loop body
LE: loop exit
PB: predicated region body
PF: predicated region fallthrough
CT: control target
= control target key end

     0   :  { %10 = vsyncpa [#allocation4], 0  ;;  %s1011_s0 = inlined_call_operand.hbm [shape: f32[8,32], index: 0, kind: input, shape index: {}]   ;;  %s1012_s1 = inlined_call_operand.hbm [shape: bf16[5,128,128], index: 1, kind: input, shape index: {}]   ;;  %s1013_s2 = inlined_call_operand.vmem [shape: f32[5,128], index: 2, kind: input, shape index: {}]   ;;  %s1014_s3 = inlined_call_operand.<no memory space> [shape: f32[1,1], index: 3, kind: input, shape index: {}]   ;;  %s1015_s4 = inlined_call_operand.hbm [shape: f32[8,128], index: 4, kind: output, shape index: {}]  }
   0x1   :  { %11 = vsyncpa [#allocation7], 0 }
   0x2   :  { %12 = vsyncpa [#allocation5], 0  ;;  %s868_s15 = smov [#allocation3]   ;;  %s869_s17 = smov [#allocation6]  }
   0x3   :  { %s19_s16 = sshll.u32 %s868_s15, 4  ;;  %s28_s18 = sshll.u32 %s869_s17, 4  ;;  %s20_s16 = int_to_ptr.vmem [resolvable:$true] %s19_s16  ;;  %s900_s18 = int_to_ptr.vmem [resolvable:$true] %s28_s18 }
   0x4   :  { %s796_s21 = scalar_lea.hbm %s1011_s0, 128 }
   0x5   :  { %p797_p0 = scmp.ne.s32.totalorder %s1011_s0, %s796_s21  ;;  %p800_p1 = scmp.lt.u32.totalorder %s796_s21, %s1011_s0 }
   0x7   :  { %p802_p2 = pnand %p800_p1, %p797_p0 }
   0x9   :  { %805 = shalt.err (!%p802_p2)
}
   0xa   :  { %s806_s26 = scalar_lea.vmem %s20_s16, 128  ;;  %p811_p4 = scmp.lt.s32.totalorder %s20_s16, %s20_s16 }
   0xb   :  { %p807_p3 = scmp.ne.s32.totalorder %s20_s16, %s806_s26  ;;  %p812_p5 = scmp.lt.s32.totalorder %s806_s26, %s806_s26 }
   0xd   :  { %p813_p6 = por %p812_p5, %p811_p4 }
   0xf   :  { %p814_p7 = pnand %p813_p6, %p807_p3 }
  0x11   :  { %817 = shalt.err (!%p814_p7)
}
  0x12   :  { %22 = dma.hbm_to_vmem [thread:$0]  %s1011_s0, 128, %s20_s16, [#allocation4]  }
  0x13   :  { %s818_s5 = scalar_lea.hbm %s1012_s1, 5120 }
  0x14   :  { %p819_p8 = scmp.ne.s32.totalorder %s1012_s1, %s818_s5  ;;  %p822_p9 = scmp.lt.u32.totalorder %s818_s5, %s1012_s1 }
  0x16   :  { %p824_p10 = pnand %p822_p9, %p819_p8 }
  0x18   :  { %827 = shalt.err (!%p824_p10)
}
  0x19   :  { %s828_s10 = scalar_lea.vmem %s900_s18, 5120  ;;  %p833_p12 = scmp.lt.s32.totalorder %s900_s18, %s900_s18 }
  0x1a   :  { %p829_p11 = scmp.ne.s32.totalorder %s900_s18, %s828_s10  ;;  %p834_p13 = scmp.lt.s32.totalorder %s828_s10, %s828_s10 }
  0x1c   :  { %p835_p0 = por %p834_p13, %p833_p12 }
  0x1e   :  { %p836_p1 = pnand %p835_p0, %p829_p11 }
  0x20   :  { %839 = shalt.err (!%p836_p1)
}
  0x21   :  { %s870_s0 = smov 64   ;;  %s871_s11 = smov 4  }
  0x22   :  { %34 = dma.hbm_to_vmem [thread:$0]  %s1012_s1, 5120, %s900_s18, [#allocation7], %s870_s0, %s870_s0, %s871_s11  }
  0x23   :  { %862 = dma.done.wait [#allocation4], 128  }
  0x24   :  { %863 = vsyncadd [#allocation4], 4294967168 }
  0x25   :  { %864 = dma.done.wait [#allocation7], 5120  }
  0x26   :  { %865 = vsyncadd [#allocation7], 4294962176  ;;  %v872_v0 = vmov 0.0   ;;  %vm873_vm0 = vmmov 0   ;;  %v762_v1 = vld [vmem:[#allocation6] sm:$0xff]   ;;  %v763_v2 = vld [vmem:[#allocation6 + $0x8] sm:$0xff]   ;;  %v961_v21 = vstv %s1014_s3 }
  0x27   :  { %667 = vmatprep.subr.bf16.mxu0 %v872_v0  ;;  %671 = vmatprep.mubr.msk.bf16.mxu0 %vm873_vm0, %v872_v0  ;;  %v47_v3 = vld [vmem:[#allocation3] sm:$0xff]  ;;  %v764_v4 = vld [vmem:[#allocation6 + $0x40] sm:$0xff]   ;;  %v765_v6 = vld [vmem:[#allocation6 + $0x48] sm:$0xff]   ;;  %vm70_vm1 = vcmask 261120   ;;  %s874_s24 = smov [#allocation8]  }
  0x28   :  { %675 = vmatprep.subr.bf16.mxu1 %v872_v0  ;;  %691 = vmatprep.mubr.msk.bf16.mxu1 %vm873_vm0, %v872_v0  ;;  %v48_v5 = vpack.c.bf16 %v47_v3, %v47_v3  ;;  %v766_v7 = vld [vmem:[#allocation6 + $0x50] sm:$0xff]   ;;  %v767_v8 = vld [vmem:[#allocation6 + $0x58] sm:$0xff]   ;;  %v768_v9 = vld [vmem:[#allocation6 + $0x60] sm:$0xff]   ;;  %s578_s25 = sshll.u32 %s874_s24, 4  ;;  %s579_s25 = int_to_ptr.vmem [resolvable:$true] %s578_s25 }
  0x29   :  { %668 = vmatpush3.bf16.msra.mxu0 %v762_v1  ;;  %676 = vmatpush3.bf16.msra.mxu1 %v764_v4  ;;  %v769_v10 = vld [vmem:[#allocation6 + $0x68] sm:$0xff]   ;;  %v770_v11 = vld [vmem:[#allocation6 + $0x70] sm:$0xff]   ;;  %v771_v12 = vld [vmem:[#allocation6 + $0x78] sm:$0xff]   ;;  %s840_s26 = scalar_lea.vmem %s579_s25, 128  ;;  %p845_p3 = scmp.lt.s32.totalorder %s579_s25, %s579_s25 }
  0x2a   :  { %669 = vmatprep.subr.bf16.mxu0 %v872_v0  ;;  %677 = vmatprep.subr.bf16.mxu1 %v872_v0  ;;  %v772_v13 = vld [vmem:[#allocation6 + $0x80] sm:$0xff]   ;;  %v773_v14 = vld [vmem:[#allocation6 + $0x88] sm:$0xff]   ;;  %v774_v15 = vld [vmem:[#allocation6 + $0x90] sm:$0xff]   ;;  %p841_p2 = scmp.ne.s32.totalorder %s579_s25, %s840_s26  ;;  %p846_p4 = scmp.lt.s32.totalorder %s840_s26, %s840_s26 }
  0x2b   :  { %v775_v16 = vld [vmem:[#allocation6 + $0x98] sm:$0xff]   ;;  %v776_v17 = vld [vmem:[#allocation6 + $0xa0] sm:$0xff]   ;;  %v777_v18 = vld [vmem:[#allocation6 + $0xa8] sm:$0xff]  }
  0x2c   :  { %v588_v19 = vld [vmem:[%s1013_s2] ss:$0 sm:$0xff]  ;;  %v778_v29 = vld [vmem:[#allocation6 + $0xb0] sm:$0xff]   ;;  %v780_v31 = vld [vmem:[#allocation6 + $0xc0] sm:$0xff]   ;;  %p847_p5 = por %p846_p4, %p845_p3 }
  0x2d   :  { %670 = vmatpush3.bf16.msra.mxu0 %v763_v2  ;;  %678 = vmatpush3.bf16.msra.mxu1 %v765_v6  ;;  %v779_v30 = vld [vmem:[#allocation6 + $0xb8] sm:$0xff]   ;;  %v781_v32 = vld [vmem:[#allocation6 + $0xc8] sm:$0xff]   ;;  %v782_v33 = vld [vmem:[#allocation6 + $0xd0] sm:$0xff]  }
  0x2e   :  { %695 = vmatprep.subr.bf16.mxu0 %v872_v0  ;;  %679 = vmatprep.subr.bf16.mxu1 %v872_v0  ;;  %v783_v34 = vld [vmem:[#allocation6 + $0xd8] sm:$0xff]   ;;  %v784_v35 = vld [vmem:[#allocation6 + $0xe0] sm:$0xff]   ;;  %v785_v36 = vld [vmem:[#allocation6 + $0xe8] sm:$0xff]   ;;  %p848_p6 = pnand %p847_p5, %p841_p2 }
  0x2f   :  { %v592_v37 = vld [vmem:[%s1013_s2 + $0x1] ss:$0 sm:$0xff]  ;;  %v786_v46 = vld [vmem:[#allocation6 + $0xf0] sm:$0xff]   ;;  %v788_v48 = vld [vmem:[#allocation6 + $0x100] sm:$0xff]  }
  0x30   :  { %672 = vmatmul.mubr.msk.bf16.vlgmr.msra.gmra.mrb[0].mxu0 %vm70_vm1, %v48_v5  ;;  %v787_v47 = vld [vmem:[#allocation6 + $0xf8] sm:$0xff]   ;;  %v789_v49 = vld [vmem:[#allocation6 + $0x108] sm:$0xff]   ;;  %v790_v50 = vld [vmem:[#allocation6 + $0x110] sm:$0xff]  }
  0x31   :  { %711 = vmatprep.mubr.msk.bf16.mxu0 %vm873_vm0, %v872_v0  ;;  %680 = vmatpush3.bf16.msra.mxu1 %v766_v7  ;;  %v791_v51 = vld [vmem:[#allocation6 + $0x118] sm:$0xff]   ;;  %v792_v52 = vld [vmem:[#allocation6 + $0x120] sm:$0xff]   ;;  %v793_v53 = vld [vmem:[#allocation6 + $0x128] sm:$0xff]  }
  0x32   :  { %681 = vmatprep.subr.bf16.mxu1 %v872_v0  ;;  %696 = vmatpush3.bf16.msra.mxu0 %v772_v13  ;;  %v601_v54 = vld [vmem:[%s1013_s2 + $0x2] ss:$0 sm:$0xff]  ;;  %v794_v63 = vld [vmem:[#allocation6 + $0x130] sm:$0xff]   ;;  %v610_v2 = vld [vmem:[%s1013_s2 + $0x3] ss:$0 sm:$0xff] }
  0x33   :  { %697 = vmatprep.subr.bf16.mxu0 %v872_v0  ;;  %v795_v1 = vld [vmem:[#allocation6 + $0x138] sm:$0xff]  }
  0x35   :  { %682 = vmatpush3.bf16.msra.mxu1 %v767_v8 }
  0x36   :  { %683 = vmatprep.subr.bf16.mxu1 %v872_v0  ;;  %698 = vmatpush3.bf16.msra.mxu0 %v773_v14 }
  0x37   :  { %699 = vmatprep.subr.bf16.mxu0 %v872_v0 }
  0x39   :  { %684 = vmatpush3.bf16.msra.mxu1 %v768_v9 }
  0x3a   :  { %685 = vmatprep.subr.bf16.mxu1 %v872_v0  ;;  %700 = vmatpush3.bf16.msra.mxu0 %v774_v15 }
  0x3b   :  { %701 = vmatprep.subr.bf16.mxu0 %v872_v0 }
  0x3d   :  { %686 = vmatpush3.bf16.msra.mxu1 %v769_v10 }
  0x3e   :  { %687 = vmatprep.subr.bf16.mxu1 %v872_v0  ;;  %702 = vmatpush3.bf16.msra.mxu0 %v775_v16 }
  0x3f   :  { %703 = vmatprep.subr.bf16.mxu0 %v872_v0 }
  0x41   :  { %688 = vmatpush3.bf16.msra.mxu1 %v770_v11 }
  0x42   :  { %689 = vmatprep.subr.bf16.mxu1 %v872_v0  ;;  %704 = vmatpush3.bf16.msra.mxu0 %v776_v17 }
  0x43   :  { %705 = vmatprep.subr.bf16.mxu0 %v872_v0 }
  0x45   :  { %690 = vmatpush3.bf16.msra.mxu1 %v771_v12 }
  0x46   :  { %715 = vmatprep.subr.bf16.mxu1 %v872_v0  ;;  %706 = vmatpush3.bf16.msra.mxu0 %v777_v18 }
  0x47   :  { %707 = vmatprep.subr.bf16.mxu0 %v872_v0 }
  0x4a   :  { %708 = vmatpush3.bf16.msra.mxu0 %v778_v29 }
  0x4b   :  { %709 = vmatprep.subr.bf16.mxu0 %v872_v0 }
  0x4e   :  { %710 = vmatpush3.bf16.msra.mxu0 %v779_v30 }
  0x4f   :  { %735 = vmatprep.subr.bf16.mxu0 %v872_v0 }
 0x103   :  { %v108_v20 = vpop.f32.mrb[0].mxu0 }
 0x104   :  { %v109_v22 = vadd.f32 %v588_v19, %v108_v20  ;;  %v673_v23 = vpop.f32.mrb[1].mxu0 }
 0x105   :  { %v111_v24 = vpop.f32.mrb[2].mxu0 }
 0x106   :  { %vm114_vm2 = vcmp.ge.f32.partialorder %v109_v22, 0.0  ;;  %v116_v25 = vmul.f32 %v961_v21, %v109_v22  ;;  %v674_v26 = vpop.f32.mrb[3].mxu0 }
 0x108   :  { %v117_v27 = vsel %vm114_vm2, %v109_v22, %v116_v25 }
 0x109   :  { %v118_v28 = vpack.c.bf16 %v117_v27, %v117_v27 }
 0x10b   :  { %692 = vmatmul.mubr.bf16.vlgmr.msra.gmra.mrb[0].mxu1 %v118_v28 }
 0x10c   :  { %731 = vmatprep.mubr.msk.bf16.mxu1 %vm873_vm0, %v872_v0  ;;  %716 = vmatpush3.bf16.msra.mxu1 %v780_v31 }
 0x10d   :  { %717 = vmatprep.subr.bf16.mxu1 %v872_v0 }
 0x110   :  { %718 = vmatpush3.bf16.msra.mxu1 %v781_v32 }
 0x111   :  { %719 = vmatprep.subr.bf16.mxu1 %v872_v0 }
 0x114   :  { %720 = vmatpush3.bf16.msra.mxu1 %v782_v33 }
 0x115   :  { %721 = vmatprep.subr.bf16.mxu1 %v872_v0 }
 0x118   :  { %722 = vmatpush3.bf16.msra.mxu1 %v783_v34 }
 0x119   :  { %723 = vmatprep.subr.bf16.mxu1 %v872_v0 }
 0x11c   :  { %724 = vmatpush3.bf16.msra.mxu1 %v784_v35 }
 0x11d   :  { %725 = vmatprep.subr.bf16.mxu1 %v872_v0 }
 0x120   :  { %726 = vmatpush3.bf16.msra.mxu1 %v785_v36 }
 0x121   :  { %727 = vmatprep.subr.bf16.mxu1 %v872_v0 }
 0x124   :  { %728 = vmatpush3.bf16.msra.mxu1 %v786_v46 }
 0x125   :  { %729 = vmatprep.subr.bf16.mxu1 %v872_v0 }
 0x128   :  { %730 = vmatpush3.bf16.msra.mxu1 %v787_v47 }
 0x1de   :  { %v223_v38 = vpop.f32.mrb[0].mxu1 }
 0x1df   :  { %v224_v39 = vadd.f32 %v592_v37, %v223_v38  ;;  %v693_v40 = vpop.f32.mrb[1].mxu1 }
 0x1e0   :  { %v226_v41 = vpop.f32.mrb[2].mxu1 }
 0x1e1   :  { %vm229_vm3 = vcmp.ge.f32.partialorder %v224_v39, 0.0  ;;  %v230_v42 = vmul.f32 %v224_v39, %v961_v21  ;;  %v694_v43 = vpop.f32.mrb[3].mxu1 }
 0x1e3   :  { %v231_v44 = vsel %vm229_vm3, %v224_v39, %v230_v42 }
 0x1e4   :  { %v232_v45 = vpack.c.bf16 %v231_v44, %v231_v44 }
 0x1e6   :  { %712 = vmatmul.mubr.bf16.vlgmr.msra.gmra.mrb[4].mxu0 %v232_v45 }
 0x1e7   :  { %751 = vmatprep.mubr.msk.bf16.mxu0 %vm873_vm0, %v872_v0  ;;  %736 = vmatpush3.bf16.msra.mxu0 %v788_v48 }
 0x1e8   :  { %737 = vmatprep.subr.bf16.mxu0 %v872_v0 }
 0x1eb   :  { %738 = vmatpush3.bf16.msra.mxu0 %v789_v49 }
 0x1ec   :  { %739 = vmatprep.subr.bf16.mxu0 %v872_v0 }
 0x1ef   :  { %740 = vmatpush3.bf16.msra.mxu0 %v790_v50 }
 0x1f0   :  { %741 = vmatprep.subr.bf16.mxu0 %v872_v0 }
 0x1f3   :  { %742 = vmatpush3.bf16.msra.mxu0 %v791_v51 }
 0x1f4   :  { %743 = vmatprep.subr.bf16.mxu0 %v872_v0 }
 0x1f7   :  { %744 = vmatpush3.bf16.msra.mxu0 %v792_v52 }
 0x1f8   :  { %745 = vmatprep.subr.bf16.mxu0 %v872_v0 }
 0x1fb   :  { %746 = vmatpush3.bf16.msra.mxu0 %v793_v53 }
 0x1fc   :  { %747 = vmatprep.subr.bf16.mxu0 %v872_v0 }
 0x1ff   :  { %748 = vmatpush3.bf16.msra.mxu0 %v794_v63 }
 0x200   :  { %749 = vmatprep.subr.bf16.mxu0 %v872_v0  ;;  %v619_v0 = vld [vmem:[%s1013_s2 + $0x4] ss:$0 sm:$0xff] }
 0x203   :  { %750 = vmatpush3.bf16.msra.mxu0 %v795_v1 }
 0x2b9   :  { %v337_v55 = vpop.f32.mrb[4].mxu0 }
 0x2ba   :  { %v338_v56 = vadd.f32 %v601_v54, %v337_v55  ;;  %v713_v57 = vpop.f32.mrb[5].mxu0 }
 0x2bb   :  { %v340_v58 = vpop.f32.mrb[6].mxu0 }
 0x2bc   :  { %vm343_vm4 = vcmp.ge.f32.partialorder %v338_v56, 0.0  ;;  %v344_v59 = vmul.f32 %v338_v56, %v961_v21  ;;  %v714_v60 = vpop.f32.mrb[7].mxu0 }
 0x2be   :  { %v345_v61 = vsel %vm343_vm4, %v338_v56, %v344_v59 }
 0x2bf   :  { %v346_v62 = vpack.c.bf16 %v345_v61, %v345_v61 }
 0x2c1   :  { %732 = vmatmul.mubr.bf16.vlgmr.msra.gmra.mrb[4].mxu1 %v346_v62 }
 0x394   :  { %v451_v3 = vpop.f32.mrb[4].mxu1 }
 0x395   :  { %v452_v4 = vadd.f32 %v610_v2, %v451_v3  ;;  %v733_v5 = vpop.f32.mrb[5].mxu1 }
 0x396   :  { %v454_v6 = vpop.f32.mrb[6].mxu1 }
 0x397   :  { %vm457_vm5 = vcmp.ge.f32.partialorder %v452_v4, 0.0  ;;  %v458_v7 = vmul.f32 %v452_v4, %v961_v21  ;;  %v734_v8 = vpop.f32.mrb[7].mxu1 }
 0x399   :  { %v459_v9 = vsel %vm457_vm5, %v452_v4, %v458_v7 }
 0x39a   :  { %v460_v10 = vpack.c.bf16 %v459_v9, %v459_v9 }
 0x39c   :  { %752 = vmatmul.mubr.bf16.vlgmr.msra.gmra.mrb[8].mxu0 %v460_v10 }
 0x46f   :  { %v565_v11 = vpop.f32.mrb[8].mxu0 }
 0x470   :  { %v566_v12 = vadd.f32 %v619_v0, %v565_v11  ;;  %v753_v13 = vpop.f32.mrb[9].mxu0 }
 0x471   :  { %v568_v14 = vpop.f32.mrb[10].mxu0 }
 0x472   :  { %571 = vst [vmem:[#allocation8] sm:$0xff] %v566_v12  ;;  %v754_v15 = vpop.f32.mrb[11].mxu0 }
 0x473   :  { %851 = shalt.err (!%p848_p6)
}
 0x474   :  { %s852_s2 = scalar_lea.hbm %s1015_s4, 128 }
 0x475   :  { %p853_p7 = scmp.ne.s32.totalorder %s1015_s4, %s852_s2  ;;  %p856_p8 = scmp.lt.u32.totalorder %s852_s2, %s1015_s4 }
 0x477   :  { %p858_p9 = pnand %p856_p8, %p853_p7 }
 0x479   :  { %861 = shalt.err (!%p858_p9)
}
 0x47a   :  { %581 = dma.vmem_to_hbm [thread:$0]  %s579_s25, 128, %s1015_s4, [#allocation5]  }
 0x47b   :  { %866 = dma.done.wait [#allocation5], 128  }
 0x47c   :  { %867 = vsyncadd [#allocation5], 4294967168 }
 0x47d   :  { %585 = vsyncpa [#allocation4], 1 }
 0x47e   :  { %586 = vsyncpa [#allocation7], 1 }
 0x47f   :  { %587 = vsyncpa [#allocation5], 1 }

</bundles_post_ra>
